<compile_context>
chip_gen: v5e
topology: v5e:2x2
jax: 0.10.0
libtpu: 0.0.40
codegen_flags: <defaults>
</compile_context>

<pallas_src>
import functools

import jax
import jax.numpy as jnp
from jax.experimental import pallas as pl
from jax.experimental.pallas import tpu as pltpu


def _policy_kernel(x_ref, w1_ref, w23_ref, b_ref, out_ref, *, hidden, action):
    # packed biases: [b1 (hidden) | b2 (action) | b3 (action)], f32
    b = b_ref[...]                       # (1, hidden + 2*action)
    b1 = b[:, :hidden]                   # (1, hidden)
    b23 = b[:, hidden:]                  # (1, 2*action)

    # fc1 (bf16 x bf16 -> f32 on MXU) + (eval-mode) dropout + relu
    x = x_ref[...].astype(jnp.bfloat16)  # cast in-kernel; hidden under MXU
    h = jnp.dot(x, w1_ref[...], preferred_element_type=jnp.float32) + b1
    h = jnp.maximum(h, 0.0)

    # fused fc2||fc3 -> y = [mean | log_std]  (single MXU pass, single store slab)
    y = jnp.dot(h.astype(w23_ref.dtype), w23_ref[...],
                preferred_element_type=jnp.float32) + b23

    # exp only on the log_std lanes (mask instead of slice+concat; keeps the
    # write contiguous, exp goes to the EUP slot which is otherwise idle).
    col = jax.lax.broadcasted_iota(jnp.int32, y.shape, 1)
    out_ref[...] = jnp.where(col < action, y, jnp.exp(y)).astype(out_ref.dtype)


def policy_network_forward(x, params):
    """x: (B, state) f32.  params: dict of w1,b1,w2,b2,w3,b3 ((in,out) layout).

    Returns (mean, std), both (B, action) f32.
    """
    B, state = x.shape
    hidden = params["w1"].shape[1]
    action = params["w2"].shape[1]

    # Resident (per-step re-used) operands: bf16 head weights, one f32 bias slab.
    w1 = params["w1"].astype(jnp.bfloat16)
    w23 = jnp.concatenate([params["w2"], params["w3"]], axis=1).astype(jnp.bfloat16)
    b_packed = jnp.concatenate(
        [params["b1"], params["b2"], params["b3"]], axis=1).astype(jnp.float32)

    # Batch tile: whole batch if small, else 1024-row tiles (multiple of 8
    # sublanes; ~0.4 MiB of double-buffered VMEM — amortizes per-step overhead).
    TB = B if B <= 1024 else 1024
    grid = (pl.cdiv(B, TB),)

    out = pl.pallas_call(
        functools.partial(_policy_kernel, hidden=hidden, action=action),
        out_shape=jax.ShapeDtypeStruct((B, 2 * action), jnp.float32),
        grid=grid,
        in_specs=[
            pl.BlockSpec((TB, state), lambda i: (i, 0)),                 # x tile (f32)
            pl.BlockSpec((state, hidden), lambda i: (0, 0)),             # w1 (resident)
            pl.BlockSpec((hidden, 2 * action), lambda i: (0, 0)),        # w2||w3
            pl.BlockSpec((1, hidden + 2 * action), lambda i: (0, 0)),    # b1|b2|b3
        ],
        out_specs=pl.BlockSpec((TB, 2 * action), lambda i: (i, 0)),
        compiler_params=pltpu.CompilerParams(
            dimension_semantics=("parallel",)),                          # 2 TCs on v7x
    )(x, w1, w23, b_packed)

    mean = out[:, :action]
    std = out[:, action:]
    return mean, std


def init_params(key, state, hidden, action):
    """Deterministic init mimicking nn.Linear's U(-1/sqrt(fan_in), 1/sqrt(fan_in))."""
    ks = jax.random.split(key, 6)

    def lin(kw, kb, fan_in, fan_out):
        bound = 1.0 / jnp.sqrt(fan_in)
        w = jax.random.uniform(kw, (fan_in, fan_out), jnp.float32, -bound, bound)
        b = jax.random.uniform(kb, (1, fan_out), jnp.float32, -bound, bound)
        return w, b

    w1, b1 = lin(ks[0], ks[1], state, hidden)
    w2, b2 = lin(ks[2], ks[3], hidden, action)
    w3, b3 = lin(ks[4], ks[5], hidden, action)
    return dict(w1=w1, b1=b1, w2=w2, b2=b2, w3=w3, b3=b3)


if __name__ == "__main__":
    # BipedalWalker-ish small shapes: state=24, hidden=32, action=4, batch=8.
    STATE, HIDDEN, ACTION, BATCH = 24, 32, 4, 8

    key = jax.random.PRNGKey(0)
    k_x, k_p = jax.random.split(key)
    x = jax.random.normal(k_x, (BATCH, STATE), jnp.float32)
    params = init_params(k_p, STATE, HIDDEN, ACTION)

    mean, std = jax.jit(policy_network_forward)(x, params)
    jax.block_until_ready((mean, std))

    # Reference in plain JAX with the same bf16-rounded matmul operands
    # (bf16 x bf16 products are exact in f32, so only accumulation order differs).
    f32 = jnp.float32
    xb = x.astype(jnp.bfloat16).astype(f32)
    w1b = params["w1"].astype(jnp.bfloat16).astype(f32)
    w2b = params["w2"].astype(jnp.bfloat16).astype(f32)
    w3b = params["w3"].astype(jnp.bfloat16).astype(f32)
    h_ref = jnp.maximum(xb @ w1b + params["b1"], 0.0)
    h_ref16 = h_ref.astype(jnp.bfloat16).astype(f32)
    mean_ref = h_ref16 @ w2b + params["b2"]
    std_ref = jnp.exp(h_ref16 @ w3b + params["b3"])

    assert mean.shape == (BATCH, ACTION) and std.shape == (BATCH, ACTION)
    assert jnp.allclose(mean, mean_ref, atol=1e-3, rtol=1e-3)
    assert jnp.allclose(std, std_ref, atol=1e-3, rtol=1e-3)

    print("KERNEL_OK")
</pallas_src>

<mosaic_0001>
module attributes {stable_mosaic.version = 11 : i64} {
  func.func @_policy_kernel(%arg0: i32, %arg1: memref<8x24xf32, #tpu.memory_space<vmem>>, %arg2: memref<24x32xbf16, #tpu.memory_space<vmem>>, %arg3: memref<32x8xbf16, #tpu.memory_space<vmem>>, %arg4: memref<1x40xf32, #tpu.memory_space<vmem>>, %arg5: memref<8x8xf32, #tpu.memory_space<vmem>>) attributes {dimension_semantics = [#tpu.dimension_semantics<parallel>], iteration_bounds = array<i64: 1>, scalar_prefetch = 0 : i64, scratch_operands = 0 : i64, tpu.core_type = #tpu.core_type<tc>, window_params = [{transform_indices = @transform_0, window_bounds = array<i64: 8, 24>}, {pipeline_mode = #tpu.pipeline_mode<synchronous>, transform_indices = @transform_1, window_bounds = array<i64: 24, 32>}, {pipeline_mode = #tpu.pipeline_mode<synchronous>, transform_indices = @transform_2, window_bounds = array<i64: 32, 8>}, {pipeline_mode = #tpu.pipeline_mode<synchronous>, transform_indices = @transform_3, window_bounds = array<i64: 1, 40>}, {transform_indices = @transform_4, window_bounds = array<i64: 8, 8>}]} {
    %c0 = arith.constant 0 : index
    %c0_0 = arith.constant 0 : index
    %0 = vector.load %arg4[%c0, %c0_0] : memref<1x40xf32, #tpu.memory_space<vmem>>, vector<1x40xf32>
    %1 = vector.extract_strided_slice %0 {offsets = [0, 0], sizes = [1, 32], strides = [1, 1]} : vector<1x40xf32> to vector<1x32xf32>
    %2 = vector.extract_strided_slice %0 {offsets = [0, 32], sizes = [1, 8], strides = [1, 1]} : vector<1x40xf32> to vector<1x8xf32>
    %c0_1 = arith.constant 0 : index
    %c0_2 = arith.constant 0 : index
    %3 = vector.load %arg1[%c0_1, %c0_2] : memref<8x24xf32, #tpu.memory_space<vmem>>, vector<8x24xf32>
    %4 = arith.truncf %3 : vector<8x24xf32> to vector<8x24xbf16>
    %c0_3 = arith.constant 0 : index
    %c0_4 = arith.constant 0 : index
    %5 = vector.load %arg2[%c0_3, %c0_4] : memref<24x32xbf16, #tpu.memory_space<vmem>>, vector<24x32xbf16>
    %cst = arith.constant dense<0.000000e+00> : vector<8x32xf32>
    %6 = tpu.matmul %4, %5, %cst {dimension_numbers = #tpu.dot_dimension_numbers<[1], [0], [0], [1], [0, 0, 1, 1], [], []>} : vector<8x24xbf16>, vector<24x32xbf16>, vector<8x32xf32> -> vector<8x32xf32>
    %7 = vector.broadcast %1 : vector<1x32xf32> to vector<8x32xf32>
    %8 = arith.addf %6, %7 : vector<8x32xf32>
    %cst_5 = arith.constant 0.000000e+00 : f32
    %9 = vector.broadcast %cst_5 : f32 to vector<8x32xf32>
    %10 = arith.maximumf %8, %9 : vector<8x32xf32>
    %11 = arith.truncf %10 : vector<8x32xf32> to vector<8x32xbf16>
    %c0_6 = arith.constant 0 : index
    %c0_7 = arith.constant 0 : index
    %12 = vector.load %arg3[%c0_6, %c0_7] : memref<32x8xbf16, #tpu.memory_space<vmem>>, vector<32x8xbf16>
    %cst_8 = arith.constant dense<0.000000e+00> : vector<8x8xf32>
    %13 = tpu.matmul %11, %12, %cst_8 {dimension_numbers = #tpu.dot_dimension_numbers<[1], [0], [0], [1], [0, 0, 1, 1], [], []>} : vector<8x32xbf16>, vector<32x8xbf16>, vector<8x8xf32> -> vector<8x8xf32>
    %14 = vector.broadcast %2 : vector<1x8xf32> to vector<8x8xf32>
    %15 = arith.addf %13, %14 : vector<8x8xf32>
    %16 = tpu.iota {dimensions = array<i32: 1>} : vector<8x8xi32>
    %c4_i32 = arith.constant 4 : i32
    %17 = vector.broadcast %c4_i32 : i32 to vector<8x8xi32>
    %18 = arith.cmpi slt, %16, %17 : vector<8x8xi32>
    %19 = math.exp %15 : vector<8x8xf32>
    %20 = arith.select %18, %15, %19 : vector<8x8xi1>, vector<8x8xf32>
    %c0_9 = arith.constant 0 : index
    %c0_10 = arith.constant 0 : index
    %21 = vector.load %arg5[%c0_9, %c0_10] : memref<8x8xf32, #tpu.memory_space<vmem>>, vector<8x8xf32>
    tpu.vector_store %arg5[%c0_9, %c0_10], %20 {strides = array<i32>} : memref<8x8xf32, #tpu.memory_space<vmem>>, vector<8x8xf32>,
    return
  }
  func.func @transform_0(%arg0: i32) -> (i32, i32) {
    %c0_i32 = arith.constant 0 : i32
    %c0_i32_0 = arith.constant 0 : i32
    return %arg0, %c0_i32 : i32, i32
  }
  func.func @transform_1(%arg0: i32) -> (i32, i32) {
    %c0_i32 = arith.constant 0 : i32
    %c0_i32_0 = arith.constant 0 : i32
    %c0_i32_1 = arith.constant 0 : i32
    return %c0_i32, %c0_i32_0 : i32, i32
  }
  func.func @transform_2(%arg0: i32) -> (i32, i32) {
    %c0_i32 = arith.constant 0 : i32
    %c0_i32_0 = arith.constant 0 : i32
    %c0_i32_1 = arith.constant 0 : i32
    return %c0_i32, %c0_i32_0 : i32, i32
  }
  func.func @transform_3(%arg0: i32) -> (i32, i32) {
    %c0_i32 = arith.constant 0 : i32
    %c0_i32_0 = arith.constant 0 : i32
    %c0_i32_1 = arith.constant 0 : i32
    return %c0_i32, %c0_i32_0 : i32, i32
  }
  func.func @transform_4(%arg0: i32) -> (i32, i32) {
    %c0_i32 = arith.constant 0 : i32
    %c0_i32_0 = arith.constant 0 : i32
    return %arg0, %c0_i32 : i32, i32
  }
}

</mosaic_0001>

<bundles_post_ra>
// kernel: policy_network_forward.1
= control target key start
LH: loop header
LB: loop body
LE: loop exit
PB: predicated region body
PF: predicated region fallthrough
CT: control target
= control target key end

     0   :  { %vm40_vm0 = vcmask 1043456   ;;  %vm36_vm1 = vcmask 195584   ;;  %s128_s23 = smov 96   ;;  %vm78_vm2 = vcmask 261120   ;;  %v95_v18 = vlaneseq  ;;  %s175_s1 = inlined_call_operand.vmem [shape: bf16[24,32], index: 1, kind: input, shape index: {}]   ;;  %s176_s3 = inlined_call_operand.vmem [shape: f32[1,40], index: 3, kind: input, shape index: {}]   ;;  %s177_s0 = inlined_call_operand.vmem [shape: f32[8,24], index: 0, kind: input, shape index: {}]   ;;  %s178_s2 = inlined_call_operand.vmem [shape: bf16[32,8], index: 2, kind: input, shape index: {}]   ;;  %s179_s4 = inlined_call_operand.vmem [shape: f32[8,8], index: 4, kind: output, shape index: {}]  }
   0x1   :  { %v23_v0 = vld [vmem:[%s175_s1 + $0x8] sm:$0xf]  ;;  %v121_v4 = vld [vmem:[%s175_s1] sm:$0xff]  ;;  %vm101_vm4 = vcmask 64512  }
   0x2   :  { %v32_v1 = vunpack.c.l.b16 %v23_v0  ;;  %v19_v5 = vld [vmem:[%s177_s0] sm:$0xff]  ;;  %v123_v8 = vld [vmem:[%s178_s2 + $0x8] sm:$0xff]  ;;  %v96_v20 = vand.u32 127, %v95_v18 }
   0x3   :  { %v20_v6 = vpack.c.bf16 %v19_v5, %v19_v5  ;;  %v125_v7 = vld [vmem:[%s176_s3] ss:$0 sm:$0xff]  ;;  %88 = vmatpush.bf16.msra.mxu1 %v123_v8 }
   0x4   :  { %v34_v2 = vpack.c.b16 %v32_v1, %v32_v1  ;;  %75 = vrot.lane.b32.xlu0 %v125_v7, %s128_s23  ;;  %v122_v9 = vld [vmem:[%s178_s2] sm:$0xff]  ;;  %vm97_vm3 = vcmp.lt.s32.totalorder %v96_v20, 4 }
   0x6   :  { %v42_v3 = vsel %vm40_vm0, %v34_v2, 0 }
   0x7   :  { %50 = vmatpush.bf16.msra.mxu0 %v42_v3  ;;  %89 = vmatpush.bf16.msra.mxu1 %v122_v9 }
   0xb   :  { %51 = vmatpush.bf16.msra.mxu0 %v121_v4 }
   0xe   :  { %111 = vmatmul.msk.bf16.vlgmr.msra.gmra.mxu0 %vm36_vm1, %v20_v6 }
  0x76   :  { %v76_v15 = vpop.permute.xlu0 %75 }
  0x8b   :  { %v53_v10 = vpop.f32.mrf.mxu0 }
  0x8c   :  { %v54_v11 = vadd.f32 %v125_v7, %v53_v10 }
  0x8e   :  { %v57_v12 = vmax.f32 %v54_v11, 0.0 }
  0x90   :  { %v58_v13 = vpack.c.bf16 %v57_v12, %v57_v12 }
  0x92   :  { %120 = vmatmul.msk.bf16.vlgmr.msra.gmra.mxu1 %vm78_vm2, %v58_v13 }
  0x93   :  { %v55_v14 = vpop.f32.mrf.mxu0 }
 0x10f   :  { %v91_v16 = vpop.f32.mrf.mxu1 }
 0x110   :  { %v92_v17 = vadd.f32 %v91_v16, %v76_v15 }
 0x112   :  { %v98_v19 = vmul.f32 1.442695, %v92_v17 }
 0x114   :  { %126 = vpow2.f32 %v98_v19 }
 0x117   :  { %v93_v21 = vpop.f32.mrf.mxu1 }
 0x11a   :  { %v127_v22 = vpop.eup %126 }
 0x11b   :  { %v100_v23 = vsel %vm97_vm3, %v92_v17, %v127_v22 }
 0x11c   :  { %102 = vst.msk [vmem:[%s179_s4] sm:$0xff] %vm101_vm4, %v100_v23 }

</bundles_post_ra>
